<compile_context>
chip_gen: v7x
topology: tpu7x:2x2x1
jax: 0.10.0
libtpu: 0.0.40
codegen_flags: <defaults>
</compile_context>

<pallas_src>
import jax
import jax.numpy as jnp
from jax.experimental import pallas as pl
from jax.experimental.pallas import tpu as pltpu


def _thresh_loss_kernel(pred_ref, gt_ref, w_ref, out_ref, acc_ref):
    """Accumulate per-lane partial sums of |pred - gt| * sqrt(w) over row tiles."""
    i = pl.program_id(1)  # inner (reduction) axis

    @pl.when(i == 0)
    def _():
        acc_ref[...] = jnp.zeros_like(acc_ref)

    diff = jnp.abs(pred_ref[...] - gt_ref[...])              # (rt, cols)
    weighted = diff * jnp.sqrt(w_ref[...])                   # (rt,1|cols) lane-broadcast
    # Lane-wide accumulator: only a sublane reduce per step, no per-step
    # cross-lane reduce / masked scalar store.
    acc_ref[...] += jnp.sum(weighted, axis=0, keepdims=True)  # (1, cols)

    @pl.when(i == pl.num_programs(1) - 1)
    def _():
        out_ref[...] = acc_ref[...].reshape(out_ref.shape)    # (1, 1, cols) partial


def thresh_loss(prediction, gt_thresh, gt_count, *, row_tile=1024, num_parallel=2):
    """Pallas ThreshLoss: mean(|prediction - gt_thresh| * sqrt(gt_count))."""
    prediction = jnp.asarray(prediction, jnp.float32)
    gt_thresh = jnp.asarray(gt_thresh, jnp.float32)
    gt_count = jnp.asarray(gt_count, jnp.float32)
    assert prediction.shape == gt_thresh.shape

    n_elems = prediction.size
    cols = prediction.shape[-1]

    pred2d = prediction.reshape(-1, cols)
    gt2d = gt_thresh.reshape(-1, cols)
    rows = pred2d.shape[0]

    # gt_count must broadcast to prediction's shape (torch semantics).
    bshape = jnp.broadcast_shapes(gt_count.shape, prediction.shape)
    assert bshape == prediction.shape, "gt_count must broadcast to prediction"

    if gt_count.ndim == 0 or gt_count.shape[-1] == 1:
        # Common case: count is constant along the last axis -> stream only a
        # (rows, 1) weight column; broadcast across lanes inside the kernel.
        w2d = jnp.broadcast_to(
            gt_count, prediction.shape[:-1] + (1,)).reshape(-1, 1)
    else:
        # Fallback: per-element weight (sqrt still computed in-kernel on EUP).
        w2d = jnp.broadcast_to(gt_count, prediction.shape).reshape(-1, cols)
    w_cols = w2d.shape[1]

    # ---- tiling ----------------------------------------------------------
    P = max(1, int(num_parallel))  # parallel split (both TCs on v7x)
    # Cap per-input tile to ~4 MiB so double-buffered inputs fit comfortably
    # in scoped VMEM on every generation (v7x has only 64 MiB physical VMEM).
    max_tile_rows = max(8, ((4 * 1024 * 1024) // (cols * 4)) // 8 * 8)
    rt = max(8, min(int(row_tile), max_tile_rows))
    # Don't over-tile tiny inputs (avoids pointless zero padding).
    rt = min(rt, ((pl.cdiv(rows, P) + 7) // 8) * 8)
    rt = max(rt, 8)

    chunk = P * rt
    rows_padded = pl.cdiv(rows, chunk) * chunk
    inner = rows_padded // chunk

    pad = rows_padded - rows
    if pad:
        # Zero padding contributes exactly 0 to the weighted sum.
        pred2d = jnp.pad(pred2d, ((0, pad), (0, 0)))
        gt2d = jnp.pad(gt2d, ((0, pad), (0, 0)))
        w2d = jnp.pad(w2d, ((0, pad), (0, 0)))

    data_spec = pl.BlockSpec((rt, cols), lambda p, i: (p * inner + i, 0))
    w_spec = pl.BlockSpec((rt, w_cols), lambda p, i: (p * inner + i, 0))

    partials = pl.pallas_call(
        _thresh_loss_kernel,
        out_shape=jax.ShapeDtypeStruct((P, 1, cols), jnp.float32),
        grid_spec=pltpu.PrefetchScalarGridSpec(
            num_scalar_prefetch=0,
            grid=(P, inner),
            in_specs=[data_spec, data_spec, w_spec],
            out_specs=pl.BlockSpec((1, 1, cols), lambda p, i: (p, 0, 0)),
            scratch_shapes=[pltpu.VMEM((1, cols), jnp.float32)],
        ),
        compiler_params=pltpu.CompilerParams(
            dimension_semantics=("parallel", "arbitrary"),
        ),
    )(pred2d, gt2d, w2d)

    # Final tiny reduction + mean scale outside the kernel.
    return jnp.sum(partials) / jnp.float32(n_elems)


if __name__ == "__main__":
    key = jax.random.PRNGKey(0)
    k1, k2, k3 = jax.random.split(key, 3)

    # Small shapes: batch of 16 samples, 128 per-sample threshold predictions.
    B, K = 16, 128
    prediction = jax.random.uniform(k1, (B, K), dtype=jnp.float32)
    gt_thresh = jax.random.uniform(k2, (B, K), dtype=jnp.float32)
    # Per-sample ground-truth count (broadcast over K), non-negative.
    gt_count = jax.random.uniform(
        k3, (B, 1), dtype=jnp.float32, minval=0.0, maxval=100.0)

    loss = thresh_loss(prediction, gt_thresh, gt_count)
    jax.block_until_ready(loss)

    # Reference check (pure JAX) for correctness.
    ref = jnp.mean(jnp.abs(prediction - gt_thresh) * jnp.sqrt(gt_count))
    assert jnp.allclose(loss, ref, rtol=1e-5, atol=1e-6), (loss, ref)

    print("KERNEL_OK")
</pallas_src>

<mosaic_0001>
module attributes {stable_mosaic.version = 11 : i64} {
  func.func @_thresh_loss_kernel(%arg0: i32, %arg1: i32, %arg2: memref<8x128xf32, #tpu.memory_space<vmem>>, %arg3: memref<8x128xf32, #tpu.memory_space<vmem>>, %arg4: memref<8x1xf32, #tpu.memory_space<vmem>>, %arg5: memref<1x1x128xf32, #tpu.memory_space<vmem>>, %arg6: memref<1x128xf32, #tpu.memory_space<vmem>>) attributes {dimension_semantics = [#tpu.dimension_semantics<parallel>, #tpu.dimension_semantics<arbitrary>], iteration_bounds = array<i64: 2, 1>, scalar_prefetch = 0 : i64, scratch_operands = 1 : i64, tpu.core_type = #tpu.core_type<tc>, window_params = [{transform_indices = @transform_0, window_bounds = array<i64: 8, 128>}, {transform_indices = @transform_1, window_bounds = array<i64: 8, 128>}, {transform_indices = @transform_2, window_bounds = array<i64: 8, 1>}, {transform_indices = @transform_3, window_bounds = array<i64: 1, 1, 128>}]} {
    %c0_i32 = arith.constant 0 : i32
    %0 = arith.cmpi eq, %arg1, %c0_i32 : i32
    %1 = arith.extui %0 : i1 to i32
    %c0_i32_0 = arith.constant 0 : i32
    %2 = arith.cmpi ne, %1, %c0_i32_0 : i32
    scf.if %2 {
      %cst_12 = arith.constant 0.000000e+00 : f32
      %19 = vector.broadcast %cst_12 : f32 to vector<1x128xf32>
      %c0_13 = arith.constant 0 : index
      %c0_14 = arith.constant 0 : index
      %20 = vector.load %arg6[%c0_13, %c0_14] : memref<1x128xf32, #tpu.memory_space<vmem>>, vector<1x128xf32>
      tpu.vector_store %arg6[%c0_13, %c0_14], %19 {strides = array<i32>} : memref<1x128xf32, #tpu.memory_space<vmem>>, vector<1x128xf32>,
    } else {
    }
    %c0 = arith.constant 0 : index
    %c0_1 = arith.constant 0 : index
    %3 = vector.load %arg2[%c0, %c0_1] : memref<8x128xf32, #tpu.memory_space<vmem>>, vector<8x128xf32>
    %c0_2 = arith.constant 0 : index
    %c0_3 = arith.constant 0 : index
    %4 = vector.load %arg3[%c0_2, %c0_3] : memref<8x128xf32, #tpu.memory_space<vmem>>, vector<8x128xf32>
    %5 = arith.subf %3, %4 : vector<8x128xf32>
    %6 = math.absf %5 : vector<8x128xf32>
    %c0_4 = arith.constant 0 : index
    %c0_5 = arith.constant 0 : index
    %7 = vector.load %arg4[%c0_4, %c0_5] : memref<8x1xf32, #tpu.memory_space<vmem>>, vector<8x1xf32>
    %8 = math.sqrt %7 : vector<8x1xf32>
    %9 = vector.broadcast %8 : vector<8x1xf32> to vector<8x128xf32>
    %10 = arith.mulf %6, %9 : vector<8x128xf32>
    %c0_6 = arith.constant 0 : index
    %c0_7 = arith.constant 0 : index
    %11 = vector.load %arg6[%c0_6, %c0_7] : memref<1x128xf32, #tpu.memory_space<vmem>>, vector<1x128xf32>
    %cst = arith.constant dense<0.000000e+00> : vector<128xf32>
    %12 = vector.multi_reduction <add>, %10, %cst [0] : vector<8x128xf32> to vector<128xf32>
    %13 = vector.shape_cast %12 : vector<128xf32> to vector<1x128xf32>
    %14 = arith.addf %11, %13 : vector<1x128xf32>
    %c0_8 = arith.constant 0 : index
    %c0_9 = arith.constant 0 : index
    %15 = vector.load %arg6[%c0_8, %c0_9] : memref<1x128xf32, #tpu.memory_space<vmem>>, vector<1x128xf32>
    tpu.vector_store %arg6[%c0_8, %c0_9], %14 {strides = array<i32>} : memref<1x128xf32, #tpu.memory_space<vmem>>, vector<1x128xf32>,
    %c0_i32_10 = arith.constant 0 : i32
    %16 = arith.cmpi eq, %arg1, %c0_i32_10 : i32
    %17 = arith.extui %16 : i1 to i32
    %c0_i32_11 = arith.constant 0 : i32
    %18 = arith.cmpi ne, %17, %c0_i32_11 : i32
    scf.if %18 {
      %c0_12 = arith.constant 0 : index
      %c0_13 = arith.constant 0 : index
      %19 = vector.load %arg6[%c0_12, %c0_13] : memref<1x128xf32, #tpu.memory_space<vmem>>, vector<1x128xf32>
      %20 = vector.shape_cast %19 : vector<1x128xf32> to vector<1x1x128xf32>
      %c0_14 = arith.constant 0 : index
      %c0_15 = arith.constant 0 : index
      %c0_16 = arith.constant 0 : index
      %21 = vector.load %arg5[%c0_14, %c0_15, %c0_16] : memref<1x1x128xf32, #tpu.memory_space<vmem>>, vector<1x1x128xf32>
      tpu.vector_store %arg5[%c0_14, %c0_15, %c0_16], %20 {strides = array<i32>} : memref<1x1x128xf32, #tpu.memory_space<vmem>>, vector<1x1x128xf32>,
    } else {
    }
    return
  }
  func.func @transform_0(%arg0: i32, %arg1: i32) -> (i32, i32) {
    %c1_i32 = arith.constant 1 : i32
    %0 = arith.muli %arg0, %c1_i32 : i32
    %1 = arith.addi %0, %arg1 : i32
    %c0_i32 = arith.constant 0 : i32
    %c0_i32_0 = arith.constant 0 : i32
    return %1, %c0_i32 : i32, i32
  }
  func.func @transform_1(%arg0: i32, %arg1: i32) -> (i32, i32) {
    %c1_i32 = arith.constant 1 : i32
    %0 = arith.muli %arg0, %c1_i32 : i32
    %1 = arith.addi %0, %arg1 : i32
    %c0_i32 = arith.constant 0 : i32
    %c0_i32_0 = arith.constant 0 : i32
    return %1, %c0_i32 : i32, i32
  }
  func.func @transform_2(%arg0: i32, %arg1: i32) -> (i32, i32) {
    %c1_i32 = arith.constant 1 : i32
    %0 = arith.muli %arg0, %c1_i32 : i32
    %1 = arith.addi %0, %arg1 : i32
    %c0_i32 = arith.constant 0 : i32
    %c0_i32_0 = arith.constant 0 : i32
    return %1, %c0_i32 : i32, i32
  }
  func.func @transform_3(%arg0: i32, %arg1: i32) -> (i32, i32, i32) {
    %c0_i32 = arith.constant 0 : i32
    %c0_i32_0 = arith.constant 0 : i32
    %c0_i32_1 = arith.constant 0 : i32
    return %arg0, %c0_i32, %c0_i32_0 : i32, i32, i32
  }
}

</mosaic_0001>

<bundles_post_ra>
// kernel: tpu_custom_call.1
= control target key start
LH: loop header
LB: loop body
LE: loop exit
PB: predicated region body
PF: predicated region fallthrough
CT: control target
= control target key end

     0   :  { %8 = vsyncpa [#allocation4], 0  ;;  %s797_s0 = inlined_call_operand.vmem [shape: f32[16,128], index: 0, kind: input, shape index: {}]   ;;  %s798_s1 = inlined_call_operand.hbm [shape: f32[16,128], index: 1, kind: input, shape index: {}]   ;;  %s799_s2 = inlined_call_operand.vmem [shape: f32[16,1], index: 2, kind: input, shape index: {}]   ;;  %s800_s3 = inlined_call_operand.hbm [shape: f32[2,1,128], index: 3, kind: output, shape index: {}]  }
   0x1   :  { %10 = vsyncpa [#allocation4 + $0x1], 0 }
   0x2   :  { %11 = vsyncpa [#allocation5], 0 }
   0x3   :  { %13 = vsyncpa [#allocation5 + $0x1], 0  ;;  %s616_s12 = smov 0   ;;  %s618_s13 = smov 0  }
   0x4   :  { %s620_s14 = smov 0   ;;  %s622_s15 = smov 0  }
   0x5   :  { %s624_s16 = smov 0   ;;  %s626_s17 = smov 0  }
   0x6 LB: > { %s398_s18 = sadd.s32 4294967295, %s590_s17   ;;  %s399_s19 = sadd.s32 4294967294, %s590_s17   ;;  %s590_s17 = sphi %s626_s17, %s19_s17   ;;  %s586_s16 = sphi %s624_s16, %s816_s16   ;;  %s582_s15 = sphi %s622_s15, %s815_s15   ;;  %s578_s14 = sphi %s620_s14, %s814_s14   ;;  %s574_s13 = sphi %s618_s13, %s813_s13   ;;  %s570_s12 = sphi %s616_s12, %s812_s12  }
   0x7   : > { %s31_s20 = sadd.s32 1, %s586_s16  ;;  %s68_s21 = sadd.s32 1, %s578_s14 }
   0x8   : > { %p33_p0 = scmp.ge.s32.totalorder %s31_s20, 2  ;;  %p75_p1 = scmp.ne.s32.totalorder %s578_s14, %s574_s13 }
   0x9   : > { %p76_p2 = scmp.eq.s32.totalorder %s590_s17, 0  ;;  %p81_p3 = scmp.ne.s32.totalorder %s574_s13, %s570_s12 }
   0xa   : > { %s818_s20 = smov (%p33_p0, %s31_s20), 0  ;;  %p82_p5 = scmp.eq.s32.totalorder %s398_s18, 0 }
   0xb   : > { %p657_p4 = por %p76_p2, %p75_p1  ;;  %s65_s23 = ssub.s32 %s586_s16, %s818_s20 }
   0xc   : > { %p133_p6 = scmp.eq.s32.totalorder %s398_s18, 1  ;;  %p66_p7 = scmp.eq.s32.totalorder %s65_s23, 0 }
   0xd   : > { %p663_p8 = por %p82_p5, %p81_p3  ;;  %p139_p10 = scmp.eq.s32.totalorder %s399_s19, 1 }
   0xe   : > { %p667_p9 = por %p133_p6, %p75_p1  ;;  %p423_p13 = scmp.lt.s32.totalorder %s590_s17, 2 }
   0xf   : > { %s672_s26 = scalar_select %p66_p7, %s578_s14, %s68_s21  }
  0x10   : > { %s804_s25 = scalar_select %p667_p9, 1, 0 }
  0x11   : > { %p674_p11 = por %p139_p10, %p81_p3  ;;  %s168_s28 = sand.u32 1, %s578_s14  }
  0x12   : > { %s402_s29 = sshll.u32 %s168_s28, 3  ;;  %s403_s30 = sshll.u32 %s586_s16, 7 }
  0x13   : > { %s805_s27 = scalar_select %p674_p11, 1, 0 }
  0x14   : > { %s685_s6 = scalar_lea.hbm %s798_s1, %s403_s30  ;;  %s172_s7 = scalar_lea.vmem [#allocation3], %s402_s29 }
  0x15   : > { %s180_s8 = sshll.u32 %s172_s7, 4  ;;  %p691_p0 = pnand %p423_p13, %p657_p4  ;;  %s687_s8 = int_to_ptr.vmem [resolvable:$true] %s180_s8 }
  0x16   : > { %s169_s10 = scalar_lea.sflag [#allocation4], %s168_s28  ;;  %s478_s11 = scalar_lea.hbm %s685_s6, 128 }
  0x17   : > { %p479_p3 = scmp.ne.s32.totalorder %s685_s6, %s478_s11  ;;  %p480_p5 = pneg %p691_p0 }
  0x18   : > { %s483_s21 = scalar_lea.hbm %s798_s1, 256  ;;  %p484_p4 = scmp.lt.u32.totalorder %s685_s6, %s798_s1 }
  0x19   : > { %p481_p6 = pnand %p480_p5, %p479_p3  ;;  %p485_p10 = scmp.lt.u32.totalorder %s483_s21, %s478_s11 }
  0x1a   : > { %p487_p12 = scmp.lt.u32.totalorder %s478_s11, %s685_s6 }
  0x1b   : > { %p482_p7 = pneg %p481_p6  ;;  %p486_p13 = por %p485_p10, %p484_p4 }
  0x1d   : > { %p488_p1 = por %p487_p12, %p486_p13 }
  0x1f   : > { %p489_p2 = pnand %p488_p1, %p482_p7 }
  0x21   : > { %492 = shalt.err (!%p489_p2)
}
  0x22   : > { %s493_s28 = scalar_lea.vmem %s687_s8, 128  ;;  %s592_s29 = smov [#allocation3]  }
  0x23   : > { %p494_p3 = scmp.ne.s32.totalorder %s687_s8, %s493_s28  ;;  %s498_s30 = sshll.u32 %s592_s29, 4  ;;  %s499_s30 = int_to_ptr.vmem [resolvable:$false] %s498_s30 }
  0x24   : > { %s500_s4 = scalar_lea.vmem %s499_s30, 256  ;;  %p501_p9 = scmp.lt.s32.totalorder %s687_s8, %s499_s30 }
  0x25   : > { %p496_p6 = pnand %p494_p3, %p480_p5  ;;  %p502_p4 = scmp.lt.s32.totalorder %s500_s4, %s493_s28 }
  0x27   : > { %p497_p11 = pneg %p496_p6  ;;  %p503_p10 = por %p502_p4, %p501_p9 }
  0x29   : > { %p504_p12 = pnand %p503_p10, %p497_p11 }
  0x2b   : > { %507 = shalt.err (!%p504_p12)
}
  0x2c   : > { %418 = dma.hbm_to_vmem [thread:$0]  (!%p691_p0), %s685_s6, 128, %s687_s8, %s169_s10  }
  0x2d   : > { %p807_p1 = scmp.lt.s32.totalorder %s590_s17, 3  ;;  %p808_p2 = scmp.ge.s32.totalorder %s590_s17, 1 }
  0x2f   : > { %p195_p5 = pnand %p808_p2, %p807_p1 }
  0x30   : > { %s727_s5 = sand.u32 (!%p195_p5), 1, %s574_s13  }
  0x31   : > { %198 = sbr.rel (%p195_p5) target bundleno = 245 (0xf5), region = 32  ;;  %s405_s7 = sshll.u32 (!%p195_p5), %s727_s5, 3 }
  0x32   : > { %s201_s11 = scalar_lea.sflag (!%p195_p5), [#allocation4], %s727_s5  ;;  %s204_s18 = scalar_lea.vmem (!%p195_p5), [#allocation3], %s405_s7 }
  0x38   : > { %561 = dma.done.wait (%p663_p8), %s201_s11, 128  }
  0x39   : > { %563 = vsyncadd (%p663_p8), %s201_s11, 4294967168  ;;  %p237_p9 = scmp.lt.s32.totalorder %s582_s15, 1  ;;  %v593_v0 = vmov 0   ;;  %v594_v1 = vmov 0.0   ;;  %v255_v9 = vld [vmem:[%s204_s18] sm:$0xff]  ;;  %s408_s23 = sshll.u32 %s582_s15, 4 }
  0x3a   : > { %475 = vset.pattern.permute.xlu0 %v593_v0  ;;  %253 = vst [vmem:[#allocation2] sm:$0x1] %v594_v1  ;;  %s235_s28 = scalar_lea.vmem [#allocation6], %s727_s5  ;;  %s748_s7 = scalar_lea.hbm %s800_s3, %s408_s23 }
  0x3b   : > { %s238_s6 = scalar_select %p237_p9, %s582_s15, 1 }
  0x3c   : > { %s299_s29 = sshll.u32 %s235_s28, 4  ;;  %s287_s11 = scalar_lea.sflag [#allocation5], %s727_s5  ;;  %s750_s29 = int_to_ptr.vmem [resolvable:$true] %s299_s29 }
  0x3d   : > { %s406_s8 = sshll.u32 %s238_s6, 3  ;;  %s508_s18 = scalar_lea.vmem %s750_s29, 16 }
  0x3e   : > { %s247_s19 = scalar_lea.vmem %s799_s2, %s406_s8  ;;  %s240_s22 = scalar_lea.vmem %s797_s0, %s406_s8 }
  0x3f   : > { %v258_v2 = vld [vmem:[%s247_s19] sm:$0xff]  ;;  %p509_p8 = scmp.ne.s32.totalorder %s750_s29, %s508_s18  ;;  %p809_p11 = scmp.ne.s32.totalorder %s804_s25, 0 }
  0x40   : > { %476 = vrsqrt.f32 %v258_v2  ;;  %vm261_vm0 = vcmp.eq.f32.partialorder %v258_v2, inf  ;;  %v264_v4 = vand.u32 2147483648, %v258_v2  ;;  %vm263_vm1 = vcmp.eq.f32.partialorder %v258_v2, 0.0  ;;  %v254_v8 = vld [vmem:[%s240_s22] sm:$0xff]  ;;  %s595_s15 = smov [#allocation6]  }
  0x41   : > { %v256_v10 = vsub.f32 %v254_v8, %v255_v9  ;;  %v272_v19 = vld [vmem:[#allocation2] sm:$0x1]  ;;  %p510_p0 = pnand %p509_p8, %p809_p11  ;;  %s512_s6 = sshll.u32 %s595_s15, 4  ;;  %s513_s6 = int_to_ptr.vmem [resolvable:$false] %s512_s6 }
  0x42   : > { %s514_s8 = scalar_lea.vmem %s513_s6, 32  ;;  %p515_p13 = scmp.lt.s32.totalorder %s750_s29, %s513_s6 }
  0x43   : > { %v257_v11 = vand.u32 2147483647, %v256_v10  ;;  %p511_p7 = pneg %p510_p0  ;;  %p516_p3 = scmp.lt.s32.totalorder %s514_s8, %s508_s18 }
  0x45   : > { %p517_p6 = por %p516_p3, %p515_p13 }
  0x47   : > { %p518_p4 = pnand %p517_p6, %p511_p7 }
  0x4a   : > { %v477_v3 = vpop.eup %476 }
  0x4b   : > { %v260_v5 = vmul.f32 %v477_v3, %v258_v2 }
  0x4d   : > { %v262_v6 = vsel %vm261_vm0, %v258_v2, %v260_v5 }
  0x4e   : > { %v265_v7 = vsel %vm263_vm1, %v264_v4, %v262_v6 }
  0x4f   : > { %268 = vperm.xlu0 %475, %v265_v7  }
  0xce   : > { %v269_v12 = vpop.permute.xlu0 %268 }
  0xcf   : > { %v271_v13 = vmul.f32 %v269_v12, %v257_v11 }
  0xd1   : > { %v273_v14 = vrot.slane %v271_v13, 4 }
  0xd3   : > { %v274_v15 = vadd.f32 %v273_v14, %v271_v13 }
  0xd5   : > { %v275_v16 = vrot.slane %v274_v15, 2 }
  0xd7   : > { %v276_v17 = vadd.f32 %v275_v16, %v274_v15 }
  0xd9   : > { %v277_v18 = vrot.slane %v276_v17, 1 }
  0xdb   : > { %v278_v20 = vadd.f32 %v277_v18, %v276_v17 }
  0xdd   : > { %v279_v21 = vadd.f32 %v278_v20, %v272_v19 }
  0xdf   : > { %280 = vst [vmem:[#allocation2] sm:$0x1] %v279_v21 }
  0xe6   : > { %v284_v22 = vld [vmem:[#allocation2] sm:$0x1] }
  0xe7   : > { %285 = vst [vmem:[%s235_s28] sm:$0x1] %v284_v22 }
  0xe8   : > { %521 = shalt.err (!%p518_p4)
}
  0xe9   : > { %s522_s5 = scalar_lea.hbm %s748_s7, 16  ;;  %s526_s19 = scalar_lea.hbm %s800_s3, 32 }
  0xea   : > { %p523_p10 = scmp.ne.s32.totalorder %s748_s7, %s522_s5  ;;  %p527_p2 = scmp.lt.u32.totalorder %s748_s7, %s800_s3 }
  0xeb   : > { %p528_p5 = scmp.lt.u32.totalorder %s526_s19, %s522_s5  ;;  %p530_p8 = scmp.lt.u32.totalorder %s522_s5, %s748_s7 }
  0xec   : > { %p524_p12 = pnand %p523_p10, %p809_p11 }
  0xed   : > { %p529_p9 = por %p528_p5, %p527_p2 }
  0xee   : > { %p525_p1 = pneg %p524_p12 }
  0xef   : > { %p531_p0 = por %p530_p8, %p529_p9 }
  0xf1   : > { %p532_p7 = pnand %p531_p0, %p525_p1 }
  0xf3   : > { %535 = shalt.err (!%p532_p7)
}
  0xf4   : > { %413 = dma.vmem_to_hbm [thread:$0]  (%p809_p11), %s750_s29, 16, %s748_s7, %s287_s11  }
  0xf5 PF: > { %s311_s22 = sand.u32 1, %s570_s12   ;;  %p810_p13 = scmp.ne.s32.totalorder %s805_s27, 0 }
  0xf6   : > { %p811_p3 = scmp.ge.s32.totalorder %s590_s17, 2  ;;  %s312_s23 = scalar_lea.sflag [#allocation5], %s311_s22 }
  0xf8   : > { %p420_p6 = pnand %p811_p3, %p810_p13 }
  0xfa   : > { %565 = dma.done.wait (!%p420_p6), %s312_s23, 16  }
  0xfb   : > { %567 = vsyncadd (!%p420_p6), %s312_s23, 4294967280  ;;  %s19_s17 = sadd.s32 1, %s590_s17   ;;  %s812_s12 = smov %s574_s13 }
  0xfc   : > { %p16_p4 = scmp.ge.s32.totalorder %s19_s17, 4   ;;  %s813_s13 = smov %s578_s14 }
  0xfd   : > { %s814_s14 = smov %s672_s26  ;;  %s815_s15 = smov %s586_s16 }
  0xfe   : > { %s816_s16 = smov %s818_s20  ;;  %18 = sbr.rel (!%p16_p4) target bundleno = 6 (0x6), region = 91 }
 0x105   :  { %316 = vsyncpa [#allocation4], 1 }
 0x106   :  { %318 = vsyncpa [#allocation4 + $0x1], 1 }
 0x107   :  { %319 = vsyncpa [#allocation5], 1 }
 0x108   :  { %321 = vsyncpa [#allocation5 + $0x1], 1 }

</bundles_post_ra>
